<compile_context>
chip_gen: v6e
topology: v6e:2x2x1
jax: 0.10.0
libtpu: 0.0.40
codegen_flags: <defaults>
</compile_context>

<pallas_src>
import functools

import jax
import jax.numpy as jnp
import numpy as np
from jax.experimental import pallas as pl
from jax.experimental.pallas import tpu as pltpu

_EPS = 1e-9
_LANES = 128
_MAX_BLOCK_ROWS = 512  # 512x128 f32 block = 256 KiB/array; safe on v5e/v6e/v7x VMEM budgets


def _bec_kernel(c_ref, x_ref, u_ref, y_ref, *, return_llrs, bipolar_input, llr_max):
    # Gumbel noise (matches torch: q = -log(-log(u + eps) + eps)).
    u1 = u_ref[0]
    u2 = u_ref[1]
    q1 = -jnp.log(-jnp.log(u1 + _EPS) + _EPS)
    q2 = -jnp.log(-jnp.log(u2 + _EPS) + _EPS)

    # Straight-through binarizer forward value: e == 1 iff a1 >= a2.
    erase = (q1 - q2) >= c_ref[0]

    x = x_ref[...]
    if return_llrs:
        xf = x.astype(jnp.float32)
        if not bipolar_input:
            xf = 2.0 * xf - 1.0
        xf = xf * jnp.float32(llr_max)
        y_ref[...] = jnp.where(erase, jnp.float32(0.0), xf).astype(y_ref.dtype)
    else:
        erased = jnp.asarray(0.0 if bipolar_input else -1.0, dtype=y_ref.dtype)
        y_ref[...] = jnp.where(erase, erased, x)


def binary_erasure_channel(x, pb, *, seed=0, return_llrs=False, bipolar_input=False,
                           llr_max=100.0, temperature=0.1, check_input=False):
    """JAX/Pallas equivalent of BinaryErasureChannel.forward((x, pb)) (forward pass only).

    `temperature` is accepted for API fidelity but cancels out of the forward decision.
    """
    del temperature  # positive scale; does not affect forward values
    orig_shape = x.shape
    orig_dtype = x.dtype

    if check_input:
        # Optional host-side validation (device->host sync; off by default for performance).
        xv = np.asarray(x, dtype=np.float32)
        lo, hi = (-1.0, 1.0) if bipolar_input else (0.0, 1.0)
        assert np.all((xv == lo) | (xv == hi)), "Input must be binary."

    # Keep kernel I/O in the native dtype for f32/bf16; otherwise compute in f32 and cast back.
    if orig_dtype in (jnp.dtype(jnp.float32), jnp.dtype(jnp.bfloat16)):
        io_dtype = orig_dtype
    else:
        io_dtype = jnp.dtype(jnp.float32)

    # Flatten to a lane-dense (rows, 128) slab.
    xf = jnp.asarray(x, io_dtype).reshape(-1)
    n = xf.size
    min_rows = 16 if io_dtype == jnp.dtype(jnp.bfloat16) else 8
    rows = max(pl.cdiv(n, _LANES), 1)
    rows_m = pl.cdiv(rows, min_rows) * min_rows
    block_rows = min(_MAX_BLOCK_ROWS, rows_m)
    rows_padded = pl.cdiv(rows_m, block_rows) * block_rows
    pad = rows_padded * _LANES - n
    x2 = jnp.pad(xf, (0, pad)).reshape(rows_padded, _LANES)

    # Erasure probability -> decision threshold c = log(1 - pb + eps) - log(pb + eps).
    pbf = jnp.clip(jnp.asarray(pb, jnp.float32).reshape(-1)[:1], 0.0, 1.0)
    c_arr = jnp.log((1.0 - pbf) + _EPS) - jnp.log(pbf + _EPS)

    # Two uniforms per element (torch.rand equivalent), drawn once in one call.
    u = jax.random.uniform(jax.random.PRNGKey(seed), (2, rows_padded, _LANES),
                           dtype=jnp.float32)

    grid = (rows_padded // block_rows,)
    kernel = functools.partial(
        _bec_kernel,
        return_llrs=return_llrs,
        bipolar_input=bipolar_input,
        llr_max=float(llr_max),
    )

    y2 = pl.pallas_call(
        kernel,
        out_shape=jax.ShapeDtypeStruct((rows_padded, _LANES), io_dtype),
        grid=grid,
        in_specs=[
            pl.BlockSpec(memory_space=pltpu.MemorySpace.SMEM),             # c   (1,) f32
            pl.BlockSpec((block_rows, _LANES), lambda i: (i, 0)),          # x
            pl.BlockSpec((2, block_rows, _LANES), lambda i: (0, i, 0)),    # u1/u2
        ],
        out_specs=pl.BlockSpec((block_rows, _LANES), lambda i: (i, 0)),
        compiler_params=pltpu.CompilerParams(
            dimension_semantics=("parallel",),  # blocks are fully independent
        ),
    )(c_arr, x2, u)

    return y2.reshape(-1)[:n].reshape(orig_shape).astype(orig_dtype)


if __name__ == "__main__":
    key = jax.random.PRNGKey(0)
    kx, _ = jax.random.split(key)

    # small NCHW binary input: (batch=2, channels=4, 16x16)
    x = jax.random.bernoulli(kx, p=0.5, shape=(2, 4, 16, 16)).astype(jnp.float32)
    pb = jnp.float32(0.2)  # erasure probability

    y = binary_erasure_channel(x, pb, seed=0)
    y = jax.block_until_ready(y)

    # sanity: outputs in {0, 1, -1}; non-erased positions equal the input
    yv = np.asarray(y)
    assert yv.shape == (2, 4, 16, 16)
    assert np.all(np.isin(yv, [-1.0, 0.0, 1.0]))
    keep = yv != -1.0
    assert np.all(yv[keep] == np.asarray(x)[keep])

    print("KERNEL_OK")
</pallas_src>

<mosaic_0001>
module attributes {stable_mosaic.version = 11 : i64} {
  func.func @_bec_kernel(%arg0: i32, %arg1: memref<1xf32, #tpu.memory_space<smem>>, %arg2: memref<16x128xf32, #tpu.memory_space<vmem>>, %arg3: memref<2x16x128xf32, #tpu.memory_space<vmem>>, %arg4: memref<16x128xf32, #tpu.memory_space<vmem>>) attributes {dimension_semantics = [#tpu.dimension_semantics<parallel>], iteration_bounds = array<i64: 1>, scalar_prefetch = 0 : i64, scratch_operands = 0 : i64, tpu.core_type = #tpu.core_type<tc>, window_params = [{transform_indices = @transform_0, window_bounds = array<i64: 1>}, {transform_indices = @transform_1, window_bounds = array<i64: 16, 128>}, {transform_indices = @transform_2, window_bounds = array<i64: 2, 16, 128>}, {transform_indices = @transform_3, window_bounds = array<i64: 16, 128>}]} {
    %c0 = arith.constant 0 : index
    %c0_0 = arith.constant 0 : index
    %c0_1 = arith.constant 0 : index
    %0 = vector.load %arg3[%c0, %c0_0, %c0_1] : memref<2x16x128xf32, #tpu.memory_space<vmem>>, vector<1x16x128xf32>
    %1 = vector.shape_cast %0 : vector<1x16x128xf32> to vector<16x128xf32>
    %c1 = arith.constant 1 : index
    %c0_2 = arith.constant 0 : index
    %c0_3 = arith.constant 0 : index
    %2 = vector.load %arg3[%c1, %c0_2, %c0_3] : memref<2x16x128xf32, #tpu.memory_space<vmem>>, vector<1x16x128xf32>
    %3 = vector.shape_cast %2 : vector<1x16x128xf32> to vector<16x128xf32>
    %cst = arith.constant 9.99999971E-10 : f32
    %4 = vector.broadcast %cst : f32 to vector<16x128xf32>
    %5 = arith.addf %1, %4 : vector<16x128xf32>
    %6 = math.log %5 : vector<16x128xf32>
    %cst_4 = arith.constant 0.000000e+00 : f32
    %7 = vector.broadcast %cst_4 : f32 to vector<16x128xf32>
    %8 = arith.subf %7, %6 : vector<16x128xf32>
    %cst_5 = arith.constant 9.99999971E-10 : f32
    %9 = vector.broadcast %cst_5 : f32 to vector<16x128xf32>
    %10 = arith.addf %8, %9 : vector<16x128xf32>
    %11 = math.log %10 : vector<16x128xf32>
    %cst_6 = arith.constant 0.000000e+00 : f32
    %12 = vector.broadcast %cst_6 : f32 to vector<16x128xf32>
    %13 = arith.subf %12, %11 : vector<16x128xf32>
    %cst_7 = arith.constant 9.99999971E-10 : f32
    %14 = vector.broadcast %cst_7 : f32 to vector<16x128xf32>
    %15 = arith.addf %3, %14 : vector<16x128xf32>
    %16 = math.log %15 : vector<16x128xf32>
    %cst_8 = arith.constant 0.000000e+00 : f32
    %17 = vector.broadcast %cst_8 : f32 to vector<16x128xf32>
    %18 = arith.subf %17, %16 : vector<16x128xf32>
    %cst_9 = arith.constant 9.99999971E-10 : f32
    %19 = vector.broadcast %cst_9 : f32 to vector<16x128xf32>
    %20 = arith.addf %18, %19 : vector<16x128xf32>
    %21 = math.log %20 : vector<16x128xf32>
    %cst_10 = arith.constant 0.000000e+00 : f32
    %22 = vector.broadcast %cst_10 : f32 to vector<16x128xf32>
    %23 = arith.subf %22, %21 : vector<16x128xf32>
    %24 = arith.subf %13, %23 : vector<16x128xf32>
    %c0_11 = arith.constant 0 : index
    %25 = memref.load %arg1[%c0_11] : memref<1xf32, #tpu.memory_space<smem>>
    %26 = vector.broadcast %25 : f32 to vector<16x128xf32>
    %27 = arith.cmpf oge, %24, %26 : vector<16x128xf32>
    %c0_12 = arith.constant 0 : index
    %c0_13 = arith.constant 0 : index
    %28 = vector.load %arg2[%c0_12, %c0_13] : memref<16x128xf32, #tpu.memory_space<vmem>>, vector<16x128xf32>
    %cst_14 = arith.constant -1.000000e+00 : f32
    %29 = vector.broadcast %cst_14 : f32 to vector<16x128xf32>
    %30 = arith.select %27, %29, %28 : vector<16x128xi1>, vector<16x128xf32>
    %c0_15 = arith.constant 0 : index
    %c0_16 = arith.constant 0 : index
    %31 = vector.load %arg4[%c0_15, %c0_16] : memref<16x128xf32, #tpu.memory_space<vmem>>, vector<16x128xf32>
    tpu.vector_store %arg4[%c0_15, %c0_16], %30 {strides = array<i32>} : memref<16x128xf32, #tpu.memory_space<vmem>>, vector<16x128xf32>,
    return
  }
  func.func @transform_0(%arg0: i32) -> i32 {
    %c0_i32 = arith.constant 0 : i32
    %c0_i32_0 = arith.constant 0 : i32
    return %c0_i32 : i32
  }
  func.func @transform_1(%arg0: i32) -> (i32, i32) {
    %c0_i32 = arith.constant 0 : i32
    %c0_i32_0 = arith.constant 0 : i32
    return %arg0, %c0_i32 : i32, i32
  }
  func.func @transform_2(%arg0: i32) -> (i32, i32, i32) {
    %c0_i32 = arith.constant 0 : i32
    %c0_i32_0 = arith.constant 0 : i32
    %c0_i32_1 = arith.constant 0 : i32
    return %c0_i32, %arg0, %c0_i32_0 : i32, i32, i32
  }
  func.func @transform_3(%arg0: i32) -> (i32, i32) {
    %c0_i32 = arith.constant 0 : i32
    %c0_i32_0 = arith.constant 0 : i32
    return %arg0, %c0_i32 : i32, i32
  }
}

</mosaic_0001>

<bundles_post_ra>
// kernel: tpu_custom_call.1
= control target key start
LH: loop header
LB: loop body
LE: loop exit
PB: predicated region body
PF: predicated region fallthrough
CT: control target
= control target key end

     0   :  { %9 = vsyncpa [#allocation4], 0  ;;  %s244_s0 = inlined_call_operand.<no memory space> [shape: f32[1], index: 0, kind: input, shape index: {}]   ;;  %s245_s1 = inlined_call_operand.hbm [shape: f32[16,128], index: 1, kind: input, shape index: {}]   ;;  %s246_s2 = inlined_call_operand.hbm [shape: f32[2,16,128], index: 2, kind: input, shape index: {}]   ;;  %s247_s3 = inlined_call_operand.hbm [shape: f32[16,128], index: 3, kind: output, shape index: {}]  }
   0x1   :  { %10 = vsyncpa [#allocation7], 0 }
   0x2   :  { %11 = vsyncpa [#allocation5], 0  ;;  %s198_s12 = smov [#allocation3]  }
   0x3   :  { %s19_s13 = sshll.u32 %s198_s12, 4  ;;  %s20_s13 = int_to_ptr.vmem [resolvable:$true] %s19_s13 }
   0x4   :  { %s140_s14 = scalar_lea.vmem %s20_s13, 256  ;;  %p145_p1 = scmp.lt.s32.totalorder %s20_s13, %s20_s13 }
   0x5   :  { %p141_p0 = scmp.ne.s32.totalorder %s20_s13, %s140_s14  ;;  %p146_p2 = scmp.lt.s32.totalorder %s140_s14, %s140_s14 }
   0x7   :  { %p147_p3 = por %p146_p2, %p145_p1 }
   0x9   :  { %p148_p4 = pnand %p147_p3, %p141_p0 }
   0xb   :  { %151 = shalt.err (!%p148_p4)
}
   0xc   :  { %s199_s15 = smov 128   ;;  %s200_s16 = smov 8  }
   0xd   :  { %25 = dma.hbm_to_vmem [thread:$0]  %s245_s1, 256, %s20_s13, [#allocation4], %s199_s15, %s199_s15, %s200_s16  }
   0xe   :  { %s201_s19 = smov [#allocation6]  }
   0xf   :  { %s31_s20 = sshll.u32 %s201_s19, 4  ;;  %s32_s20 = int_to_ptr.vmem [resolvable:$true] %s31_s20 }
  0x10   :  { %s160_s21 = scalar_lea.vmem %s32_s20, 512  ;;  %p165_p6 = scmp.lt.s32.totalorder %s32_s20, %s32_s20 }
  0x11   :  { %p161_p5 = scmp.ne.s32.totalorder %s32_s20, %s160_s21  ;;  %p166_p7 = scmp.lt.s32.totalorder %s160_s21, %s160_s21 }
  0x13   :  { %p167_p8 = por %p166_p7, %p165_p6 }
  0x15   :  { %p168_p9 = pnand %p167_p8, %p161_p5 }
  0x17   :  { %171 = shalt.err (!%p168_p9)
}
  0x18   :  { %37 = dma.hbm_to_vmem [thread:$0]  %s246_s2, 512, %s32_s20, [#allocation7], %s199_s15, %s199_s15, %s200_s16  }
  0x19   :  { %192 = dma.done.wait [#allocation4], 256  }
  0x1a   :  { %193 = vsyncadd [#allocation4], 4294967040 }
  0x1b   :  { %194 = dma.done.wait [#allocation7], 512  }
  0x1c   :  { %195 = vsyncadd [#allocation7], 4294966784  ;;  %v44_v0 = vld [vmem:[#allocation6] sm:$0xff]  ;;  %v47_v1 = vld [vmem:[#allocation6 + $0x10] sm:$0xff]  ;;  %v84_v34 = vstv %s244_s0  ;;  %s202_s24 = smov [#allocation8]  }
  0x1d   :  { %v49_v2 = vadd.f32 1e-09, %v44_v0  ;;  %v65_v3 = vadd.f32 1e-09, %v47_v1  ;;  %v45_v4 = vld [vmem:[#allocation6 + $0x8] sm:$0xff]  ;;  %v48_v5 = vld [vmem:[#allocation6 + $0x18] sm:$0xff] }
  0x1e   :  { %v50_v6 = vadd.f32 1e-09, %v45_v4  ;;  %v66_v7 = vadd.f32 1e-09, %v48_v5  ;;  %v87_v37 = vld [vmem:[#allocation3] sm:$0xff]  ;;  %s98_s25 = sshll.u32 %s202_s24, 4  ;;  %s99_s25 = int_to_ptr.vmem [resolvable:$true] %s98_s25 }
  0x1f   :  { %116 = vlog2.f32 %v49_v2  ;;  %v88_v40 = vld [vmem:[#allocation3 + $0x8] sm:$0xff]  ;;  %s172_s26 = scalar_lea.vmem %s99_s25, 256  ;;  %p177_p11 = scmp.lt.s32.totalorder %s99_s25, %s99_s25 }
  0x20   :  { %118 = vlog2.f32 %v65_v3  ;;  %p173_p10 = scmp.ne.s32.totalorder %s99_s25, %s172_s26  ;;  %p178_p12 = scmp.lt.s32.totalorder %s172_s26, %s172_s26 }
  0x21   :  { %120 = vlog2.f32 %v50_v6 }
  0x22   :  { %122 = vlog2.f32 %v66_v7  ;;  %p179_p13 = por %p178_p12, %p177_p11 }
  0x24   :  { %p180_p0 = pnand %p179_p13, %p173_p10 }
  0x2c   :  { %v117_v8 = vpop.eup %116 }
  0x2d   :  { %v119_v9 = vpop.eup %118  ;;  %v52_v10 = vmul.f32 0.6931472, %v117_v8 }
  0x2e   :  { %v121_v11 = vpop.eup %120  ;;  %v68_v12 = vmul.f32 0.6931472, %v119_v9 }
  0x2f   :  { %v123_v13 = vpop.eup %122  ;;  %v55_v14 = vsub.f32 0.0, %v52_v10  ;;  %v54_v15 = vmul.f32 0.6931472, %v121_v11 }
  0x30   :  { %v71_v16 = vsub.f32 0.0, %v68_v12  ;;  %v70_v17 = vmul.f32 0.6931472, %v123_v13 }
  0x31   :  { %v57_v18 = vadd.f32 1e-09, %v55_v14  ;;  %v56_v19 = vsub.f32 0.0, %v54_v15 }
  0x32   :  { %v73_v20 = vadd.f32 1e-09, %v71_v16  ;;  %v72_v21 = vsub.f32 0.0, %v70_v17 }
  0x33   :  { %124 = vlog2.f32 %v57_v18  ;;  %v58_v22 = vadd.f32 1e-09, %v56_v19 }
  0x34   :  { %126 = vlog2.f32 %v73_v20  ;;  %v74_v23 = vadd.f32 1e-09, %v72_v21 }
  0x35   :  { %128 = vlog2.f32 %v58_v22 }
  0x36   :  { %130 = vlog2.f32 %v74_v23 }
  0x40   :  { %v125_v24 = vpop.eup %124 }
  0x41   :  { %v127_v25 = vpop.eup %126  ;;  %v60_v26 = vmul.f32 0.6931472, %v125_v24 }
  0x42   :  { %v129_v27 = vpop.eup %128  ;;  %v76_v28 = vmul.f32 0.6931472, %v127_v25 }
  0x43   :  { %v131_v29 = vpop.eup %130  ;;  %v63_v30 = vsub.f32 0.0, %v60_v26  ;;  %v62_v31 = vmul.f32 0.6931472, %v129_v27 }
  0x44   :  { %v79_v32 = vsub.f32 0.0, %v76_v28  ;;  %v78_v33 = vmul.f32 0.6931472, %v131_v29 }
  0x45   :  { %v64_v35 = vsub.f32 0.0, %v62_v31 }
  0x46   :  { %v81_v36 = vsub.f32 %v63_v30, %v79_v32  ;;  %v80_v38 = vsub.f32 0.0, %v78_v33 }
  0x48   :  { %vm85_vm0 = vcmp.ge.f32.partialorder %v81_v36, %v84_v34  ;;  %v82_v39 = vsub.f32 %v64_v35, %v80_v38 }
  0x49   :  { %v89_v41 = vsel %vm85_vm0, -1.0, %v87_v37 }
  0x4a   :  { %91 = vst [vmem:[#allocation8] sm:$0xff] %v89_v41  ;;  %vm86_vm1 = vcmp.ge.f32.partialorder %v82_v39, %v84_v34 }
  0x4b   :  { %v90_v42 = vsel %vm86_vm1, -1.0, %v88_v40 }
  0x4c   :  { %92 = vst [vmem:[#allocation8 + $0x8] sm:$0xff] %v90_v42 }
  0x4d   :  { %183 = shalt.err (!%p180_p0)
}
  0x4e   :  { %104 = dma.vmem_to_hbm [thread:$0]  %s99_s25, 256, %s247_s3, [#allocation5], %s199_s15, %s199_s15, %s200_s16  }
  0x4f   :  { %196 = dma.done.wait [#allocation5], 256  }
  0x50   :  { %197 = vsyncadd [#allocation5], 4294967040 }
  0x51   :  { %108 = vsyncpa [#allocation4], 1 }
  0x52   :  { %109 = vsyncpa [#allocation7], 1 }
  0x53   :  { %110 = vsyncpa [#allocation5], 1 }

</bundles_post_ra>
